<compile_context>
chip_gen: v6e
topology: v6e:2x2x1
jax: 0.10.0
libtpu: 0.0.40
codegen_flags: <defaults>
</compile_context>

<pallas_src>
import functools

import jax
import jax.numpy as jnp
from jax.experimental import pallas as pl
from jax.experimental.pallas import tpu as pltpu


def _round_up(n, m):
    return ((n + m - 1) // m) * m


def _pad2d(a, rows, cols):
    pr, pc = rows - a.shape[0], cols - a.shape[1]
    if pr == 0 and pc == 0:
        return a
    return jnp.pad(a, ((0, pr), (0, pc)))


def ffn_kernel(x_ref, w1_ref, b1_ref, w2_ref, b2_ref, o_ref, acc_ref):
    # grid = (row tiles [parallel], d_ff tiles [arbitrary, reduction])
    j = pl.program_id(1)

    @pl.when(j == 0)
    def _():
        acc_ref[...] = jnp.zeros_like(acc_ref)

    # First linear for this d_ff slab: bf16 MXU matmul, f32 accumulation.
    h = jnp.dot(x_ref[...], w1_ref[...], preferred_element_type=jnp.float32)
    # Bias + ReLU in f32 on the VPU (slack under MXU; v5e has no bf16 VPU).
    h = jnp.maximum(h + b1_ref[...], 0.0)

    # Second linear partial sum: accumulate into the resident f32 scratch.
    acc_ref[...] += jnp.dot(h.astype(w2_ref.dtype), w2_ref[...],
                            preferred_element_type=jnp.float32)

    @pl.when(j == pl.num_programs(1) - 1)
    def _():
        o_ref[...] = (acc_ref[...] + b2_ref[...]).astype(o_ref.dtype)


@functools.partial(jax.jit, static_argnames=("tm", "tff"))
def position_wise_feed_forward(x, w1, b1, w2, b2, *, tm=512, tff=512):
    """x: (batch, seq, d_model) float32 -> (batch, seq, d_model) float32."""
    B, S, d_model = x.shape
    d_ff = w1.shape[1]
    M = B * S
    compute_dtype = jnp.bfloat16

    # Lane-dense padding of feature dims; sublane/tile padding of rows.
    dm_p = _round_up(d_model, 128)
    tm_eff = min(tm, _round_up(M, 8))
    M_p = _round_up(M, tm_eff)
    dff_p = _round_up(d_ff, 128)
    tff_eff = min(tff, dff_p)
    dff_p = _round_up(dff_p, tff_eff)

    x2 = _pad2d(x.reshape(M, d_model), M_p, dm_p).astype(compute_dtype)
    w1p = _pad2d(w1, dm_p, dff_p).astype(compute_dtype)
    w2p = _pad2d(w2, dff_p, dm_p).astype(compute_dtype)
    b1p = _pad2d(b1.reshape(1, d_ff), 1, dff_p).astype(jnp.float32)
    b2p = _pad2d(b2.reshape(1, d_model), 1, dm_p).astype(jnp.float32)

    grid = (M_p // tm_eff, dff_p // tff_eff)

    out2 = pl.pallas_call(
        ffn_kernel,
        out_shape=jax.ShapeDtypeStruct((M_p, dm_p), jnp.float32),
        grid_spec=pltpu.PrefetchScalarGridSpec(
            num_scalar_prefetch=0,
            grid=grid,
            in_specs=[
                pl.BlockSpec((tm_eff, dm_p), lambda i, j: (i, 0)),    # x rows
                pl.BlockSpec((dm_p, tff_eff), lambda i, j: (0, j)),   # W1 cols
                pl.BlockSpec((1, tff_eff), lambda i, j: (0, j)),      # b1 slab
                pl.BlockSpec((tff_eff, dm_p), lambda i, j: (j, 0)),   # W2 rows
                pl.BlockSpec((1, dm_p), lambda i, j: (0, 0)),         # b2
            ],
            out_specs=pl.BlockSpec((tm_eff, dm_p), lambda i, j: (i, 0)),
            scratch_shapes=[pltpu.VMEM((tm_eff, dm_p), jnp.float32)],
        ),
        compiler_params=pltpu.CompilerParams(
            dimension_semantics=("parallel", "arbitrary"),
            vmem_limit_bytes=64 * 1024 * 1024,
        ),
    )(x2, w1p, b1p, w2p, b2p)

    return out2[:M, :d_model].astype(x.dtype).reshape(B, S, d_model)


def init_params(key, d_model, d_ff):
    """Deterministic init mimicking torch.nn.Linear (uniform +-1/sqrt(fan_in))."""
    k1, k2, k3, k4 = jax.random.split(key, 4)
    lim1 = 1.0 / (d_model ** 0.5)
    lim2 = 1.0 / (d_ff ** 0.5)
    w1 = jax.random.uniform(k1, (d_model, d_ff), jnp.float32, -lim1, lim1)
    b1 = jax.random.uniform(k2, (d_ff,), jnp.float32, -lim1, lim1)
    w2 = jax.random.uniform(k3, (d_ff, d_model), jnp.float32, -lim2, lim2)
    b2 = jax.random.uniform(k4, (d_model,), jnp.float32, -lim2, lim2)
    return w1, b1, w2, b2


def _check(batch, seq, d_model, d_ff, key):
    kx, kp = jax.random.split(key)
    x = jax.random.normal(kx, (batch, seq, d_model), jnp.float32)
    w1, b1, w2, b2 = init_params(kp, d_model, d_ff)

    out = position_wise_feed_forward(x, w1, b1, w2, b2)
    out = jax.block_until_ready(out)

    ref = jnp.maximum(x @ w1 + b1, 0.0) @ w2 + b2
    assert out.shape == (batch, seq, d_model)
    err = float(jnp.max(jnp.abs(out - ref)))
    # bf16 MXU inputs with f32 accumulation -> relaxed tolerance vs f32 ref.
    assert jnp.allclose(out, ref, atol=5e-2, rtol=5e-2), err
    return err


if __name__ == "__main__":
    key = jax.random.PRNGKey(0)
    k1, k2 = jax.random.split(key)

    # lane-dense small shapes
    _check(batch=2, seq=8, d_model=128, d_ff=256, key=k1)
    # ragged shapes exercising the padding path (d_model<128, odd seq/d_ff)
    _check(batch=2, seq=7, d_model=96, d_ff=200, key=k2)

    print("KERNEL_OK")
</pallas_src>

<mosaic_0001>
module attributes {stable_mosaic.version = 11 : i64} {
  func.func @ffn_kernel(%arg0: i32, %arg1: i32, %arg2: memref<16x128xbf16, #tpu.memory_space<vmem>>, %arg3: memref<128x256xbf16, #tpu.memory_space<vmem>>, %arg4: memref<1x256xf32, #tpu.memory_space<vmem>>, %arg5: memref<256x128xbf16, #tpu.memory_space<vmem>>, %arg6: memref<1x128xf32, #tpu.memory_space<vmem>>, %arg7: memref<16x128xf32, #tpu.memory_space<vmem>>, %arg8: memref<16x128xf32, #tpu.memory_space<vmem>>) attributes {dimension_semantics = [#tpu.dimension_semantics<parallel>, #tpu.dimension_semantics<arbitrary>], iteration_bounds = array<i64: 1, 1>, scalar_prefetch = 0 : i64, scratch_operands = 1 : i64, tpu.core_type = #tpu.core_type<tc>, window_params = [{transform_indices = @transform_0, window_bounds = array<i64: 16, 128>}, {transform_indices = @transform_1, window_bounds = array<i64: 128, 256>}, {transform_indices = @transform_2, window_bounds = array<i64: 1, 256>}, {transform_indices = @transform_3, window_bounds = array<i64: 256, 128>}, {pipeline_mode = #tpu.pipeline_mode<synchronous>, transform_indices = @transform_4, window_bounds = array<i64: 1, 128>}, {transform_indices = @transform_5, window_bounds = array<i64: 16, 128>}]} {
    %c0_i32 = arith.constant 0 : i32
    %0 = arith.cmpi eq, %arg1, %c0_i32 : i32
    %1 = arith.extui %0 : i1 to i32
    %c0_i32_0 = arith.constant 0 : i32
    %2 = arith.cmpi ne, %1, %c0_i32_0 : i32
    scf.if %2 {
      %cst_16 = arith.constant 0.000000e+00 : f32
      %20 = vector.broadcast %cst_16 : f32 to vector<16x128xf32>
      %c0_17 = arith.constant 0 : index
      %c0_18 = arith.constant 0 : index
      %21 = vector.load %arg8[%c0_17, %c0_18] : memref<16x128xf32, #tpu.memory_space<vmem>>, vector<16x128xf32>
      tpu.vector_store %arg8[%c0_17, %c0_18], %20 {strides = array<i32>} : memref<16x128xf32, #tpu.memory_space<vmem>>, vector<16x128xf32>,
    } else {
    }
    %c0 = arith.constant 0 : index
    %c0_1 = arith.constant 0 : index
    %3 = vector.load %arg2[%c0, %c0_1] : memref<16x128xbf16, #tpu.memory_space<vmem>>, vector<16x128xbf16>
    %c0_2 = arith.constant 0 : index
    %c0_3 = arith.constant 0 : index
    %4 = vector.load %arg3[%c0_2, %c0_3] : memref<128x256xbf16, #tpu.memory_space<vmem>>, vector<128x256xbf16>
    %cst = arith.constant dense<0.000000e+00> : vector<16x256xf32>
    %5 = tpu.matmul %3, %4, %cst {dimension_numbers = #tpu.dot_dimension_numbers<[1], [0], [0], [1], [0, 0, 1, 1], [], []>} : vector<16x128xbf16>, vector<128x256xbf16>, vector<16x256xf32> -> vector<16x256xf32>
    %c0_4 = arith.constant 0 : index
    %c0_5 = arith.constant 0 : index
    %6 = vector.load %arg4[%c0_4, %c0_5] : memref<1x256xf32, #tpu.memory_space<vmem>>, vector<1x256xf32>
    %7 = vector.broadcast %6 : vector<1x256xf32> to vector<16x256xf32>
    %8 = arith.addf %5, %7 : vector<16x256xf32>
    %cst_6 = arith.constant 0.000000e+00 : f32
    %9 = vector.broadcast %cst_6 : f32 to vector<16x256xf32>
    %10 = arith.maximumf %8, %9 : vector<16x256xf32>
    %c0_7 = arith.constant 0 : index
    %c0_8 = arith.constant 0 : index
    %11 = vector.load %arg8[%c0_7, %c0_8] : memref<16x128xf32, #tpu.memory_space<vmem>>, vector<16x128xf32>
    %12 = arith.truncf %10 : vector<16x256xf32> to vector<16x256xbf16>
    %c0_9 = arith.constant 0 : index
    %c0_10 = arith.constant 0 : index
    %13 = vector.load %arg5[%c0_9, %c0_10] : memref<256x128xbf16, #tpu.memory_space<vmem>>, vector<256x128xbf16>
    %cst_11 = arith.constant dense<0.000000e+00> : vector<16x128xf32>
    %14 = tpu.matmul %12, %13, %cst_11 {dimension_numbers = #tpu.dot_dimension_numbers<[1], [0], [0], [1], [0, 0, 1, 1], [], []>} : vector<16x256xbf16>, vector<256x128xbf16>, vector<16x128xf32> -> vector<16x128xf32>
    %15 = arith.addf %11, %14 : vector<16x128xf32>
    %c0_12 = arith.constant 0 : index
    %c0_13 = arith.constant 0 : index
    %16 = vector.load %arg8[%c0_12, %c0_13] : memref<16x128xf32, #tpu.memory_space<vmem>>, vector<16x128xf32>
    tpu.vector_store %arg8[%c0_12, %c0_13], %15 {strides = array<i32>} : memref<16x128xf32, #tpu.memory_space<vmem>>, vector<16x128xf32>,
    %c0_i32_14 = arith.constant 0 : i32
    %17 = arith.cmpi eq, %arg1, %c0_i32_14 : i32
    %18 = arith.extui %17 : i1 to i32
    %c0_i32_15 = arith.constant 0 : i32
    %19 = arith.cmpi ne, %18, %c0_i32_15 : i32
    scf.if %19 {
      %c0_16 = arith.constant 0 : index
      %c0_17 = arith.constant 0 : index
      %20 = vector.load %arg8[%c0_16, %c0_17] : memref<16x128xf32, #tpu.memory_space<vmem>>, vector<16x128xf32>
      %c0_18 = arith.constant 0 : index
      %c0_19 = arith.constant 0 : index
      %21 = vector.load %arg6[%c0_18, %c0_19] : memref<1x128xf32, #tpu.memory_space<vmem>>, vector<1x128xf32>
      %22 = vector.broadcast %21 : vector<1x128xf32> to vector<16x128xf32>
      %23 = arith.addf %20, %22 : vector<16x128xf32>
      %c0_20 = arith.constant 0 : index
      %c0_21 = arith.constant 0 : index
      %24 = vector.load %arg7[%c0_20, %c0_21] : memref<16x128xf32, #tpu.memory_space<vmem>>, vector<16x128xf32>
      tpu.vector_store %arg7[%c0_20, %c0_21], %23 {strides = array<i32>} : memref<16x128xf32, #tpu.memory_space<vmem>>, vector<16x128xf32>,
    } else {
    }
    return
  }
  func.func @transform_0(%arg0: i32, %arg1: i32) -> (i32, i32) {
    %c0_i32 = arith.constant 0 : i32
    %c0_i32_0 = arith.constant 0 : i32
    return %arg0, %c0_i32 : i32, i32
  }
  func.func @transform_1(%arg0: i32, %arg1: i32) -> (i32, i32) {
    %c0_i32 = arith.constant 0 : i32
    %c0_i32_0 = arith.constant 0 : i32
    return %c0_i32, %arg1 : i32, i32
  }
  func.func @transform_2(%arg0: i32, %arg1: i32) -> (i32, i32) {
    %c0_i32 = arith.constant 0 : i32
    %c0_i32_0 = arith.constant 0 : i32
    return %c0_i32, %arg1 : i32, i32
  }
  func.func @transform_3(%arg0: i32, %arg1: i32) -> (i32, i32) {
    %c0_i32 = arith.constant 0 : i32
    %c0_i32_0 = arith.constant 0 : i32
    return %arg1, %c0_i32 : i32, i32
  }
  func.func @transform_4(%arg0: i32, %arg1: i32) -> (i32, i32) {
    %c0_i32 = arith.constant 0 : i32
    %c0_i32_0 = arith.constant 0 : i32
    %c0_i32_1 = arith.constant 0 : i32
    return %c0_i32, %c0_i32_0 : i32, i32
  }
  func.func @transform_5(%arg0: i32, %arg1: i32) -> (i32, i32) {
    %c0_i32 = arith.constant 0 : i32
    %c0_i32_0 = arith.constant 0 : i32
    return %arg0, %c0_i32 : i32, i32
  }
}

</mosaic_0001>

<bundles_post_ra>
// kernel: position_wise_feed_forward.1
= control target key start
LH: loop header
LB: loop body
LE: loop exit
PB: predicated region body
PF: predicated region fallthrough
CT: control target
= control target key end

     0   :  { %v523_v2 = vmov 0   ;;  %s665_s0 = inlined_call_operand.vmem [shape: bf16[16,128], index: 0, kind: input, shape index: {}]   ;;  %s666_s1 = inlined_call_operand.vmem [shape: bf16[128,256], index: 1, kind: input, shape index: {}]   ;;  %s667_s2 = inlined_call_operand.vmem [shape: f32[1,256], index: 2, kind: input, shape index: {}]   ;;  %s668_s3 = inlined_call_operand.vmem [shape: bf16[256,128], index: 3, kind: input, shape index: {}]   ;;  %s669_s4 = inlined_call_operand.vmem [shape: f32[1,128], index: 4, kind: input, shape index: {}]   ;;  %s670_s5 = inlined_call_operand.hbm [shape: f32[16,128], index: 5, kind: output, shape index: {}]  }
   0x1   :  { %v460_v0 = vld [vmem:[%s666_s1 + $0x74] ss:$8 sps:$4 sm:$0xff]   ;;  %v462_v1 = vld [vmem:[%s666_s1 + $0x70] ss:$8 sps:$4 sm:$0xff]   ;;  %176 = vmatprep.mubr.bf16.mxu0 %v523_v2  ;;  %v463_v3 = vld [vmem:[%s666_s1 + $0x64] ss:$8 sps:$4 sm:$0xff]  }
   0x2   :  { %144 = vmatprep.subr.bf16.mxu0 %v460_v0  ;;  %v465_v4 = vld [vmem:[%s666_s1 + $0x60] ss:$8 sps:$4 sm:$0xff]   ;;  %v466_v5 = vld [vmem:[%s666_s1 + $0x54] ss:$8 sps:$4 sm:$0xff]   ;;  %v468_v6 = vld [vmem:[%s666_s1 + $0x50] ss:$8 sps:$4 sm:$0xff]  }
   0x3   :  { %145 = vmatpush1.bf16.msra.mxu0 %v462_v1  ;;  %v469_v7 = vld [vmem:[%s666_s1 + $0x44] ss:$8 sps:$4 sm:$0xff]   ;;  %v471_v8 = vld [vmem:[%s666_s1 + $0x40] ss:$8 sps:$4 sm:$0xff]   ;;  %v472_v9 = vld [vmem:[%s666_s1 + $0x34] ss:$8 sps:$4 sm:$0xff]  }
   0x4   :  { %146 = vmatprep.subr.bf16.mxu0 %v463_v3  ;;  %v485_v10 = vld [vmem:[%s668_s3 + $0x78] sm:$0xff]   ;;  %v475_v13 = vld [vmem:[%s666_s1 + $0x24] ss:$8 sps:$4 sm:$0xff]   ;;  %v487_v14 = vld [vmem:[%s668_s3 + $0x70] sm:$0xff]  }
   0x5   :  { %v474_v11 = vld [vmem:[%s666_s1 + $0x30] ss:$8 sps:$4 sm:$0xff]   ;;  %434 = vmatprep.subr.bf16.mxu1 %v485_v10  ;;  %v489_v16 = vld [vmem:[%s668_s3 + $0x68] sm:$0xff]   ;;  %v478_v18 = vld [vmem:[%s666_s1 + $0x14] ss:$8 sps:$4 sm:$0xff]  }
   0x6   :  { %v486_v12 = vld [vmem:[%s668_s3 + $0x38] sm:$0xff]   ;;  %v488_v15 = vld [vmem:[%s668_s3 + $0x30] sm:$0xff]   ;;  %v477_v17 = vld [vmem:[%s666_s1 + $0x20] ss:$8 sps:$4 sm:$0xff]  }
   0x7   :  { %147 = vmatpush1.bf16.msra.mxu0 %v465_v4  ;;  %435 = vmatpush3.bf16.msra.mxu1 %v486_v12  ;;  %v490_v19 = vld [vmem:[%s668_s3 + $0x28] sm:$0xff]   ;;  %v491_v20 = vld [vmem:[%s668_s3 + $0x60] sm:$0xff]   ;;  %v480_v21 = vld [vmem:[%s666_s1 + $0x10] ss:$8 sps:$4 sm:$0xff]  }
   0x8   :  { %148 = vmatprep.subr.bf16.mxu0 %v466_v5  ;;  %436 = vmatprep.subr.bf16.mxu1 %v487_v14  ;;  %v492_v22 = vld [vmem:[%s668_s3 + $0x20] sm:$0xff]   ;;  %v493_v24 = vld [vmem:[%s668_s3 + $0x58] sm:$0xff]  }
   0x9   :  { %v481_v23 = vld [vmem:[%s666_s1 + $0x4] ss:$8 sps:$4 sm:$0xff]  }
   0xb   :  { %149 = vmatpush1.bf16.msra.mxu0 %v468_v6  ;;  %437 = vmatpush3.bf16.msra.mxu1 %v488_v15 }
   0xc   :  { %150 = vmatprep.subr.bf16.mxu0 %v469_v7  ;;  %438 = vmatprep.subr.bf16.mxu1 %v489_v16 }
   0xf   :  { %151 = vmatpush1.bf16.msra.mxu0 %v471_v8  ;;  %439 = vmatpush3.bf16.msra.mxu1 %v490_v19 }
  0x10   :  { %152 = vmatprep.subr.bf16.mxu0 %v472_v9  ;;  %440 = vmatprep.subr.bf16.mxu1 %v491_v20 }
  0x13   :  { %153 = vmatpush1.bf16.msra.mxu0 %v474_v11 }
  0x14   :  { %154 = vmatprep.subr.bf16.mxu0 %v475_v13 }
  0x17   :  { %155 = vmatpush1.bf16.msra.mxu0 %v477_v17 }
  0x18   :  { %156 = vmatprep.subr.bf16.mxu0 %v478_v18 }
  0x19   :  { %10 = vsyncpa [#allocation4], 0  ;;  %v483_v25 = vld [vmem:[%s666_s1] ss:$8 sps:$4 sm:$0xff]   ;;  %441 = vmatpush3.bf16.msra.mxu1 %v492_v22  ;;  %v494_v26 = vld [vmem:[%s668_s3 + $0x18] sm:$0xff]   ;;  %v48_v34 = vlaneseq  ;;  %s524_s9 = smov [#allocation3]  }
  0x1a   :  { %442 = vmatprep.subr.bf16.mxu1 %v493_v24  ;;  %v484_v27 = vld [vmem:[%s665_s0] sm:$0xff]   ;;  %v495_v28 = vld [vmem:[%s668_s3 + $0x50] sm:$0xff]   ;;  %v497_v30 = vld [vmem:[%s668_s3 + $0x48] sm:$0xff]   ;;  %s389_s10 = sshll.u32 %s524_s9, 4  ;;  %s390_s10 = int_to_ptr.vmem [resolvable:$true] %s389_s10 }
  0x1b   :  { %157 = vmatpush1.bf16.msra.mxu0 %v480_v21  ;;  %v496_v29 = vld [vmem:[%s668_s3 + $0x10] sm:$0xff]   ;;  %v498_v31 = vld [vmem:[%s668_s3 + $0x8] sm:$0xff]   ;;  %v499_v32 = vld [vmem:[%s668_s3 + $0x40] sm:$0xff]   ;;  %v49_v35 = vshrl.u32 %v48_v34, 7  ;;  %s501_s11 = scalar_lea.vmem %s390_s10, 256  ;;  %p506_p1 = scmp.lt.s32.totalorder %s390_s10, %s390_s10 }
  0x1c   :  { %158 = vmatprep.subr.bf16.mxu0 %v481_v23  ;;  %v500_v33 = vld [vmem:[%s668_s3] sm:$0xff]   ;;  %p502_p0 = scmp.ne.s32.totalorder %s390_s10, %s501_s11  ;;  %p507_p2 = scmp.lt.s32.totalorder %s501_s11, %s501_s11 }
  0x1d   :  { %443 = vmatpush3.bf16.msra.mxu1 %v494_v26  ;;  %v54_v36 = vsub.s32 1, %v49_v35  ;;  %v50_v37 = vsub.s32 0, %v49_v35  ;;  %v46_v38 = vld [vmem:[%s667_s2] sm:$0x3] }
  0x1e   :  { %444 = vmatprep.subr.bf16.mxu1 %v495_v28  ;;  %v433_v57 = vld [vmem:[%s669_s4] ss:$0 sm:$0xff]  ;;  %p508_p3 = por %p507_p2, %p506_p1 }
  0x1f   :  { %159 = vmatpush1.bf16.msra.mxu0 %v483_v25  ;;  %v55_v40 = vrot.slane %v46_v38, %v54_v36  ;;  %v51_v41 = vrot.slane %v46_v38, %v50_v37 }
  0x20   :  { %p509_p4 = pnand %p508_p3, %p502_p0 }
  0x21   :  { %445 = vmatpush3.bf16.msra.mxu1 %v496_v29 }
  0x22   :  { %177 = vmatmul.mubr.bf16.vlgmr.msra.gmra.mxu0 %v484_v27  ;;  %446 = vmatprep.subr.bf16.mxu1 %v497_v30 }
  0x25   :  { %447 = vmatpush3.bf16.msra.mxu1 %v498_v31 }
  0x26   :  { %448 = vmatprep.subr.bf16.mxu1 %v499_v32 }
  0x29   :  { %449 = vmatpush3.bf16.msra.mxu1 %v500_v33 }
  0xe2   :  { %v178_v39 = vpop.f32.mrf.mxu0 }
  0xe3   :  { %v179_v46 = vadd.f32 %v178_v39, %v51_v41 }
  0xe4   :  { %v180_v42 = vpop.f32.mrf.mxu0 }
  0xe5   :  { %v181_v44 = vadd.f32 %v180_v42, %v55_v40  ;;  %v187_v52 = vmax.f32 %v179_v46, 0.0 }
  0xe6   :  { %v182_v43 = vpop.f32.mrf.mxu0 }
  0xe7   :  { %v183_v45 = vadd.f32 %v182_v43, %v51_v41  ;;  %v188_v50 = vmax.f32 %v181_v44, 0.0 }
  0xe8   :  { %v184_v47 = vpop.f32.mrf.mxu0 }
  0xe9   :  { %v185_v48 = vadd.f32 %v184_v47, %v55_v40  ;;  %v189_v49 = vmax.f32 %v183_v45, 0.0 }
  0xeb   :  { %v190_v51 = vmax.f32 %v185_v48, 0.0  ;;  %v193_v54 = vpack.c.bf16 %v189_v49, %v187_v52 }
  0xed   :  { %v194_v53 = vpack.c.bf16 %v190_v51, %v188_v50 }
  0xef   :  { %355 = vmatprep.mubr.bf16.mxu1 %v194_v53 }
  0xf0   :  { %356 = vmatmul.mubr.bf16.vlgmr.msra.gmra.mxu1 %v193_v54 }
 0x1b0   :  { %v450_v55 = vpop.f32.mrf.mxu1 }
 0x1b2   :  { %v451_v56 = vpop.f32.mrf.mxu1 }
 0x1b3   :  { %v452_v58 = vadd.f32 %v451_v56, %v450_v55 }
 0x1b4   :  { %v453_v59 = vpop.f32.mrf.mxu1 }
 0x1b5   :  { %v380_v60 = vadd.f32 %v452_v58, %v433_v57 }
 0x1b6   :  { %v454_v61 = vpop.f32.mrf.mxu1 }
 0x1b7   :  { %382 = vst [vmem:[#allocation3] sm:$0xff] %v380_v60  ;;  %v455_v62 = vadd.f32 %v454_v61, %v453_v59 }
 0x1b9   :  { %v381_v63 = vadd.f32 %v455_v62, %v433_v57 }
 0x1bb   :  { %383 = vst [vmem:[#allocation3 + $0x8] sm:$0xff] %v381_v63 }
 0x1bc   :  { %512 = shalt.err (!%p509_p4)
}
 0x1bd   :  { %s525_s12 = smov 128   ;;  %s526_s4 = smov 8  }
 0x1be   :  { %395 = dma.vmem_to_hbm [thread:$0]  %s390_s10, 256, %s670_s5, [#allocation4], %s525_s12, %s525_s12, %s526_s4  }
 0x1bf   :  { %521 = dma.done.wait [#allocation4], 256  }
 0x1c0   :  { %522 = vsyncadd [#allocation4], 4294967040 }
 0x1c1   :  { %399 = vsyncpa [#allocation4], 1 }

</bundles_post_ra>
